<compile_context>
chip_gen: v5e
topology: v5e:2x2
jax: 0.10.0
libtpu: 0.0.40
codegen_flags: <defaults>
</compile_context>

<pallas_src>
import functools
import math

import jax
import jax.numpy as jnp
from jax import lax
from jax.experimental import pallas as pl
from jax.experimental.pallas import tpu as pltpu


# ----------------------------------------------------------------------------
# Pallas kernel: one grid step = (batch bi, query tile qi), covering all heads.
#   temp_ref: (nh, 1, 1)    f32   (resident)
#   q_ref:    (nh, ch, TQ)  channel-first query tile (TQ on the lane axis)
#   k_ref:    (nh, nk, ch)  token-major reduced keys  (resident per batch)
#   v_ref:    (nh, ch, nk)  channel-first reduced values (resident per batch)
#   proj_ref: (dim1, dim1)  project_out 1x1-conv weight (resident)
#   tgt_ref:  (dim1, TQ)    residual tile
#   o_ref:    (dim1, TQ)    fused output tile (lane-dense)
# ----------------------------------------------------------------------------
def _reduced_attn_kernel(temp_ref, q_ref, k_ref, v_ref, proj_ref, tgt_ref, o_ref):
    eps2 = jnp.float32(1e-24)  # F.normalize eps=1e-12, squared
    is_bf16 = q_ref.dtype == jnp.bfloat16

    # --- normalize k (tiny tensor) in f32, fold the per-head temperature in.
    temp = temp_ref[...].astype(jnp.float32)                       # (nh, 1, 1)
    k = k_ref[...].astype(jnp.float32)                             # (nh, nk, ch)
    k_inv = lax.rsqrt(jnp.maximum(jnp.sum(k * k, axis=2, keepdims=True), eps2))
    kn = k * (k_inv * temp)                                        # (nh, nk, ch)

    # --- normalize q.  bf16 path avoids materializing a full f32 copy:
    # f32-accumulated sum of squares, bf16 multiply on the bf16-native VPU.
    if is_bf16:
        q = q_ref[...]                                             # (nh, ch, TQ) bf16
        ss = jnp.sum(jnp.square(q), axis=1, keepdims=True, dtype=jnp.float32)
        q_scale = lax.rsqrt(jnp.maximum(ss, eps2))                 # (nh, 1, TQ) f32
        qn = q * q_scale.astype(jnp.bfloat16)                      # bf16
        kn = kn.astype(jnp.bfloat16)
    else:
        q = q_ref[...].astype(jnp.float32)
        q_scale = lax.rsqrt(jnp.maximum(jnp.sum(q * q, axis=1, keepdims=True), eps2))
        qn = q * q_scale                                           # f32

    # --- logits^T: (nh, nk, TQ) — batched matmul, contraction over ch (small K).
    logits_t = jnp.einsum('hkc,hcq->hkq', kn, qn,
                          preferred_element_type=jnp.float32)

    # --- softmax over the reduced-token axis (axis=1), f32 math.
    m = jnp.max(logits_t, axis=1, keepdims=True)                   # (nh, 1, TQ)
    e = jnp.exp(logits_t - m)
    s = jnp.sum(e, axis=1, keepdims=True)                          # (nh, 1, TQ)
    if is_bf16:
        attn_t = e * pl.reciprocal(s, approx=True)                 # EUP, cheap
    else:
        attn_t = e * pl.reciprocal(s, approx=False)                # exact, f32 parity

    # TODO(synk): nn.Dropout(attn_drop) only implemented for p == 0.0 (module default).

    # --- out: (nh, ch, TQ) — batched matmul, contraction over nk.
    v = v_ref[...]
    out = jnp.einsum('hck,hkq->hcq', v, attn_t.astype(v.dtype),
                     preferred_element_type=jnp.float32)

    # --- fused epilogue: project_out (1x1 conv) + residual add.
    # (nh, ch, TQ) -> (nh*ch, TQ) is a no-op sublane merge for ch % 8 == 0.
    nh, ch, tq = out.shape
    out_flat = out.reshape(nh * ch, tq)                            # (dim1, TQ)
    proj = proj_ref[...]                                           # (dim1, dim1)
    y = jnp.dot(proj, out_flat.astype(proj.dtype),
                preferred_element_type=jnp.float32)                # (dim1, TQ)
    o_ref[...] = (y + tgt_ref[...].astype(jnp.float32)).astype(o_ref.dtype)


def _pick_tq(nq, target):
    """Largest multiple of 128 dividing nq that is <= target (>=128);
    falls back to the full extent when nq is not a multiple of 128."""
    if nq % 128 != 0:
        return nq
    tq = min(max(target // 128, 1) * 128, nq)
    while nq % tq != 0:
        tq -= 128
    return tq


def reduced_attention_core(q, k, v, tgt_flat, proj_w, temperature, *, tq_target=512):
    """q: (b, nh, ch, nq); k: (b, nh, nk, ch); v: (b, nh, ch, nk);
    tgt_flat: (b, dim1, nq); proj_w: (dim1, dim1); temperature: (nh, 1, 1).
    Returns (b, dim1, nq) = proj_w @ attention(q,k,v) + tgt_flat."""
    b, nh, ch, nq = q.shape
    nk = v.shape[3]
    dim1 = nh * ch
    # TQ: tune per chip (v7x 64 MiB VMEM -> keep tiles modest; v6e can go larger;
    # v5e prefers smaller).  512 is a reasonable default; sweep.
    tq = _pick_tq(nq, tq_target)
    grid = (b, nq // tq)

    grid_spec = pltpu.PrefetchScalarGridSpec(
        num_scalar_prefetch=0,
        grid=grid,
        in_specs=[
            # temperature: resident across the whole grid.
            pl.BlockSpec((nh, 1, 1), lambda bi, qi: (0, 0, 0)),
            # q: streamed per (batch, query tile).
            pl.BlockSpec((None, nh, ch, tq), lambda bi, qi: (bi, 0, 0, qi)),
            # k / v: resident across query tiles (index ignores qi).
            pl.BlockSpec((None, nh, nk, ch), lambda bi, qi: (bi, 0, 0, 0)),
            pl.BlockSpec((None, nh, ch, nk), lambda bi, qi: (bi, 0, 0, 0)),
            # project_out weight: resident across the whole grid.
            pl.BlockSpec((dim1, dim1), lambda bi, qi: (0, 0)),
            # residual tile (tgt), streamed with q.
            pl.BlockSpec((None, dim1, tq), lambda bi, qi: (bi, 0, qi)),
        ],
        out_specs=pl.BlockSpec((None, dim1, tq), lambda bi, qi: (bi, 0, qi)),
    )
    return pl.pallas_call(
        _reduced_attn_kernel,
        out_shape=jax.ShapeDtypeStruct((b, dim1, nq), q.dtype),
        grid_spec=grid_spec,
        compiler_params=pltpu.CompilerParams(
            # Both axes are independent -> megacore sharding on v7x.
            dimension_semantics=("parallel", "parallel")),
    )(temperature.astype(jnp.float32), q, k, v, proj_w, tgt_flat)


# ----------------------------------------------------------------------------
# Glue ops in plain JAX (NCHW, matching PyTorch).
# ----------------------------------------------------------------------------
def conv1x1(x, w, b=None):
    # x: (b, c_in, h, w), w: (c_out, c_in)
    y = jnp.einsum('oc,bchw->bohw', w, x)
    if b is not None:
        y = y + b.reshape(1, -1, 1, 1)
    return y


def dwconv3x3(x, w):
    # x: (b, c, h, w), w: (c, 1, 3, 3) depthwise, padding=1
    c = x.shape[1]
    return lax.conv_general_dilated(
        x, w, window_strides=(1, 1), padding=((1, 1), (1, 1)),
        dimension_numbers=('NCHW', 'OIHW', 'NCHW'), feature_group_count=c)


def interpolate_nearest(x, size):
    # F.interpolate(mode='nearest'): src = floor(dst * in / out)
    b, c, ih, iw = x.shape
    oh, ow = size
    if (ih, iw) == (oh, ow):
        return x
    rows = (jnp.arange(oh) * ih) // oh
    cols = (jnp.arange(ow) * iw) // ow
    return x[:, :, rows[:, None], cols[None, :]]


def adaptive_avg_pool2d(x, out_size):
    b, c, ih, iw = x.shape
    oh = ow = out_size
    # TODO(synk): only the evenly-divisible (uniform-bin) adaptive pooling case is implemented.
    assert ih % oh == 0 and iw % ow == 0, (ih, iw, out_size)
    return x.reshape(b, c, oh, ih // oh, ow, iw // ow).mean(axis=(3, 5))


# ----------------------------------------------------------------------------
# Full ReducedAttention forward (project_out + residual fused into the kernel).
# ----------------------------------------------------------------------------
def reduced_attention_forward(params, tgt, mem, num_heads, reduce_ratio=4, tq_target=512):
    b, dim1, h, w = tgt.shape
    assert dim1 % num_heads == 0
    ch = dim1 // num_heads
    nq = h * w

    # interp_mem = match_c(F.interpolate(mem, size=(h, w)))     (nearest)
    interp_mem = conv1x1(interpolate_nearest(mem, (h, w)),
                         params['match_c_w'], params['match_c_b'])
    # residual = adaptive_avg_pool2d(interp_mem - tgt, w // reduce_ratio)
    reduced = adaptive_avg_pool2d(interp_mem - tgt, w // reduce_ratio)

    # q = q_dw(q(tgt)); kv = kv_dw(kv(residual)); k, v = kv.chunk(2, dim=1)
    q = dwconv3x3(conv1x1(tgt, params['q_w']), params['q_dw_w'])
    kv = dwconv3x3(conv1x1(reduced, params['kv_w']), params['kv_dw_w'])
    k, v = jnp.split(kv, 2, axis=1)                 # each (b, dim1, hr, wr)
    hr, wr = k.shape[2], k.shape[3]
    nk = hr * wr

    # Kernel layouts: q/v channel-first (contiguous reshape, lane-dense out);
    # k token-major (tiny transpose of the reduced tensor only).
    q_r = q.reshape(b, num_heads, ch, nq)
    k_r = k.reshape(b, num_heads, ch, nk).transpose(0, 1, 3, 2)
    v_r = v.reshape(b, num_heads, ch, nk)
    tgt_flat = tgt.reshape(b, dim1, nq)

    out = reduced_attention_core(q_r, k_r, v_r, tgt_flat, params['proj_w'],
                                 params['temperature'], tq_target=tq_target)
    return out.reshape(b, dim1, h, w)


# Pure-JAX reference (mirrors the PyTorch forward) for correctness checking.
def reduced_attention_reference(params, tgt, mem, num_heads, reduce_ratio=4):
    b, dim1, h, w = tgt.shape
    ch = dim1 // num_heads
    interp_mem = conv1x1(interpolate_nearest(mem, (h, w)),
                         params['match_c_w'], params['match_c_b'])
    reduced = adaptive_avg_pool2d(interp_mem - tgt, w // reduce_ratio)
    q = dwconv3x3(conv1x1(tgt, params['q_w']), params['q_dw_w'])
    kv = dwconv3x3(conv1x1(reduced, params['kv_w']), params['kv_dw_w'])
    k, v = jnp.split(kv, 2, axis=1)
    nq = h * w
    nk = k.shape[2] * k.shape[3]
    # 'b (head c) h w -> b head (h w) c'
    qr = q.reshape(b, num_heads, ch, nq).transpose(0, 1, 3, 2)
    kr = k.reshape(b, num_heads, ch, nk).transpose(0, 1, 3, 2)
    vr = v.reshape(b, num_heads, ch, nk).transpose(0, 1, 3, 2)

    def l2norm(x):
        return x / jnp.maximum(jnp.linalg.norm(x, axis=-1, keepdims=True), 1e-12)

    qn, kn = l2norm(qr), l2norm(kr)
    attn = jnp.einsum('bhqc,bhkc->bhqk', qn, kn) * params['temperature'][None]
    attn = jax.nn.softmax(attn, axis=-1)
    out = jnp.einsum('bhqk,bhkc->bhqc', attn, vr)
    out = out.transpose(0, 1, 3, 2).reshape(b, dim1, h, w)
    out = conv1x1(out, params['proj_w'])
    return out + tgt


def init_params(key, dim1, dim2, num_heads, dtype=jnp.float32):
    ks = jax.random.split(key, 6)

    def kaiming(k, shape, fan_in):
        return (jax.random.normal(k, shape, jnp.float32)
                * math.sqrt(2.0 / fan_in)).astype(dtype)

    return {
        'temperature': jnp.ones((num_heads, 1, 1), jnp.float32),
        'match_c_w': kaiming(ks[0], (dim1, dim2), dim2),          # 1x1 conv (bias=True, zero-init)
        'match_c_b': jnp.zeros((dim1,), dtype),
        'q_w':       kaiming(ks[1], (dim1, dim1), dim1),          # 1x1 conv, bias=False
        'q_dw_w':    kaiming(ks[2], (dim1, 1, 3, 3), 9),          # depthwise 3x3
        'kv_w':      kaiming(ks[3], (2 * dim1, dim1), dim1),      # 1x1 conv
        'kv_dw_w':   kaiming(ks[4], (2 * dim1, 1, 3, 3), 9),      # depthwise 3x3
        'proj_w':    kaiming(ks[5], (dim1, dim1), dim1),          # 1x1 conv (fused in kernel)
    }


if __name__ == "__main__":
    # Small, module-consistent shapes: h*w = 256, tq_target=128 -> grid (b, 2)
    # so the query-tiling path is exercised.
    b, dim1, dim2, num_heads, h, w = 2, 32, 16, 2, 16, 16
    reduce_ratio = 4

    key = jax.random.PRNGKey(0)
    k_tgt, k_mem, k_par = jax.random.split(key, 3)
    tgt = jax.random.normal(k_tgt, (b, dim1, h, w), jnp.float32)
    mem = jax.random.normal(k_mem, (b, dim2, 8, 8), jnp.float32)
    params = init_params(k_par, dim1, dim2, num_heads)

    fwd = jax.jit(functools.partial(reduced_attention_forward,
                                    num_heads=num_heads,
                                    reduce_ratio=reduce_ratio,
                                    tq_target=128))
    out = fwd(params, tgt, mem)
    jax.block_until_ready(out)

    ref = reduced_attention_reference(params, tgt, mem, num_heads, reduce_ratio)

    assert out.shape == (b, dim1, h, w), out.shape
    assert bool(jnp.all(jnp.isfinite(out)))
    assert bool(jnp.allclose(out, ref, rtol=2e-2, atol=2e-2)), \
        float(jnp.max(jnp.abs(out - ref)))
    print("KERNEL_OK")
</pallas_src>

<mosaic_0001>
module attributes {stable_mosaic.version = 11 : i64} {
  func.func @_reduced_attn_kernel(%arg0: i32, %arg1: i32, %arg2: memref<2x1x1xf32, #tpu.memory_space<vmem>>, %arg3: memref<1x2x16x128xf32, #tpu.memory_space<vmem>>, %arg4: memref<1x2x16x16xf32, #tpu.memory_space<vmem>>, %arg5: memref<1x2x16x16xf32, #tpu.memory_space<vmem>>, %arg6: memref<32x32xf32, #tpu.memory_space<vmem>>, %arg7: memref<1x32x128xf32, #tpu.memory_space<vmem>>, %arg8: memref<1x32x128xf32, #tpu.memory_space<vmem>>) attributes {dimension_semantics = [#tpu.dimension_semantics<parallel>, #tpu.dimension_semantics<parallel>], iteration_bounds = array<i64: 2, 2>, scalar_prefetch = 0 : i64, scratch_operands = 0 : i64, tpu.core_type = #tpu.core_type<tc>, window_params = [{pipeline_mode = #tpu.pipeline_mode<synchronous>, transform_indices = @transform_0, window_bounds = array<i64: 2, 1, 1>}, {transform_indices = @transform_1, window_bounds = array<i64: 1, 2, 16, 128>}, {transform_indices = @transform_2, window_bounds = array<i64: 1, 2, 16, 16>}, {transform_indices = @transform_3, window_bounds = array<i64: 1, 2, 16, 16>}, {pipeline_mode = #tpu.pipeline_mode<synchronous>, transform_indices = @transform_4, window_bounds = array<i64: 32, 32>}, {transform_indices = @transform_5, window_bounds = array<i64: 1, 32, 128>}, {transform_indices = @transform_6, window_bounds = array<i64: 1, 32, 128>}]} {
    %c0 = arith.constant 0 : index
    %c0_0 = arith.constant 0 : index
    %c0_1 = arith.constant 0 : index
    %0 = vector.load %arg2[%c0, %c0_0, %c0_1] : memref<2x1x1xf32, #tpu.memory_space<vmem>>, vector<2x1x1xf32>
    %c0_2 = arith.constant 0 : index
    %c0_3 = arith.constant 0 : index
    %c0_4 = arith.constant 0 : index
    %c0_5 = arith.constant 0 : index
    %1 = vector.load %arg4[%c0_2, %c0_3, %c0_4, %c0_5] : memref<1x2x16x16xf32, #tpu.memory_space<vmem>>, vector<1x2x16x16xf32>
    %2 = vector.shape_cast %1 : vector<1x2x16x16xf32> to vector<2x16x16xf32>
    %3 = arith.mulf %2, %2 : vector<2x16x16xf32>
    %cst = arith.constant dense<0.000000e+00> : vector<2x16xf32>
    %4 = vector.multi_reduction <add>, %3, %cst [2] : vector<2x16x16xf32> to vector<2x16xf32>
    %5 = vector.shape_cast %4 : vector<2x16xf32> to vector<2x16x1xf32>
    %cst_6 = arith.constant 1.000000e-24 : f32
    %6 = vector.broadcast %cst_6 : f32 to vector<2x16x1xf32>
    %7 = arith.maximumf %5, %6 : vector<2x16x1xf32>
    %8 = math.rsqrt %7 : vector<2x16x1xf32>
    %9 = vector.broadcast %0 : vector<2x1x1xf32> to vector<2x16x1xf32>
    %10 = arith.mulf %8, %9 : vector<2x16x1xf32>
    %11 = vector.broadcast %10 : vector<2x16x1xf32> to vector<2x16x16xf32>
    %12 = arith.mulf %2, %11 : vector<2x16x16xf32>
    %c0_7 = arith.constant 0 : index
    %c0_8 = arith.constant 0 : index
    %c0_9 = arith.constant 0 : index
    %c0_10 = arith.constant 0 : index
    %13 = vector.load %arg3[%c0_7, %c0_8, %c0_9, %c0_10] : memref<1x2x16x128xf32, #tpu.memory_space<vmem>>, vector<1x2x16x128xf32>
    %14 = vector.shape_cast %13 : vector<1x2x16x128xf32> to vector<2x16x128xf32>
    %15 = arith.mulf %14, %14 : vector<2x16x128xf32>
    %cst_11 = arith.constant dense<0.000000e+00> : vector<2x128xf32>
    %16 = vector.multi_reduction <add>, %15, %cst_11 [1] : vector<2x16x128xf32> to vector<2x128xf32>
    %17 = vector.shape_cast %16 : vector<2x128xf32> to vector<2x1x128xf32>
    %cst_12 = arith.constant 1.000000e-24 : f32
    %18 = vector.broadcast %cst_12 : f32 to vector<2x1x128xf32>
    %19 = arith.maximumf %17, %18 : vector<2x1x128xf32>
    %20 = math.rsqrt %19 : vector<2x1x128xf32>
    %21 = vector.broadcast %20 : vector<2x1x128xf32> to vector<2x16x128xf32>
    %22 = arith.mulf %14, %21 : vector<2x16x128xf32>
    "tpu.trace_start"() <{level = 10 : i32, message = "hkc,hcq->hkq"}> : () -> ()
    %cst_13 = arith.constant dense<0.000000e+00> : vector<2x16x128xf32>
    %23 = tpu.matmul %12, %22, %cst_13 {dimension_numbers = #tpu.dot_dimension_numbers<[2], [1], [1], [2], [0, 0, 0, 1, 1, 2], [0], [0]>} : vector<2x16x16xf32>, vector<2x16x128xf32>, vector<2x16x128xf32> -> vector<2x16x128xf32>
    "tpu.trace_stop"() : () -> ()
    %cst_14 = arith.constant dense<0xFF800000> : vector<2x128xf32>
    %24 = vector.multi_reduction <maximumf>, %23, %cst_14 [1] : vector<2x16x128xf32> to vector<2x128xf32>
    %25 = vector.shape_cast %24 : vector<2x128xf32> to vector<2x1x128xf32>
    %26 = vector.broadcast %25 : vector<2x1x128xf32> to vector<2x16x128xf32>
    %27 = arith.subf %23, %26 : vector<2x16x128xf32>
    %28 = math.exp %27 : vector<2x16x128xf32>
    %cst_15 = arith.constant dense<0.000000e+00> : vector<2x128xf32>
    %29 = vector.multi_reduction <add>, %28, %cst_15 [1] : vector<2x16x128xf32> to vector<2x128xf32>
    %30 = vector.shape_cast %29 : vector<2x128xf32> to vector<2x1x128xf32>
    %31 = tpu.reciprocal %30 : vector<2x1x128xf32> -> vector<2x1x128xf32>
    %32 = vector.broadcast %31 : vector<2x1x128xf32> to vector<2x16x128xf32>
    %33 = arith.mulf %28, %32 : vector<2x16x128xf32>
    %c0_16 = arith.constant 0 : index
    %c0_17 = arith.constant 0 : index
    %c0_18 = arith.constant 0 : index
    %c0_19 = arith.constant 0 : index
    %34 = vector.load %arg5[%c0_16, %c0_17, %c0_18, %c0_19] : memref<1x2x16x16xf32, #tpu.memory_space<vmem>>, vector<1x2x16x16xf32>
    %35 = vector.shape_cast %34 : vector<1x2x16x16xf32> to vector<2x16x16xf32>
    "tpu.trace_start"() <{level = 10 : i32, message = "hck,hkq->hcq"}> : () -> ()
    %cst_20 = arith.constant dense<0.000000e+00> : vector<2x16x128xf32>
    %36 = tpu.matmul %35, %33, %cst_20 {dimension_numbers = #tpu.dot_dimension_numbers<[2], [1], [1], [2], [0, 0, 0, 1, 1, 2], [0], [0]>} : vector<2x16x16xf32>, vector<2x16x128xf32>, vector<2x16x128xf32> -> vector<2x16x128xf32>
    "tpu.trace_stop"() : () -> ()
    %37 = vector.shape_cast %36 : vector<2x16x128xf32> to vector<32x128xf32>
    %c0_21 = arith.constant 0 : index
    %c0_22 = arith.constant 0 : index
    %38 = vector.load %arg6[%c0_21, %c0_22] : memref<32x32xf32, #tpu.memory_space<vmem>>, vector<32x32xf32>
    %cst_23 = arith.constant dense<0.000000e+00> : vector<32x128xf32>
    %39 = tpu.matmul %38, %37, %cst_23 {dimension_numbers = #tpu.dot_dimension_numbers<[1], [0], [0], [1], [0, 0, 1, 1], [], []>} : vector<32x32xf32>, vector<32x128xf32>, vector<32x128xf32> -> vector<32x128xf32>
    %c0_24 = arith.constant 0 : index
    %c0_25 = arith.constant 0 : index
    %c0_26 = arith.constant 0 : index
    %40 = vector.load %arg7[%c0_24, %c0_25, %c0_26] : memref<1x32x128xf32, #tpu.memory_space<vmem>>, vector<1x32x128xf32>
    %41 = vector.shape_cast %40 : vector<1x32x128xf32> to vector<32x128xf32>
    %42 = arith.addf %39, %41 : vector<32x128xf32>
    %c0_27 = arith.constant 0 : index
    %c0_28 = arith.constant 0 : index
    %c0_29 = arith.constant 0 : index
    %43 = vector.load %arg8[%c0_27, %c0_28, %c0_29] : memref<1x32x128xf32, #tpu.memory_space<vmem>>, vector<1x32x128xf32>
    %44 = vector.shape_cast %43 : vector<1x32x128xf32> to vector<32x128xf32>
    %45 = vector.shape_cast %42 : vector<32x128xf32> to vector<1x32x128xf32>
    tpu.vector_store %arg8[%c0_27, %c0_28, %c0_29], %45 {strides = array<i32>} : memref<1x32x128xf32, #tpu.memory_space<vmem>>, vector<1x32x128xf32>,
    return
  }
  func.func @transform_0(%arg0: i32, %arg1: i32) -> (i32, i32, i32) {
    %c0_i32 = arith.constant 0 : i32
    %c0_i32_0 = arith.constant 0 : i32
    %c0_i32_1 = arith.constant 0 : i32
    %c0_i32_2 = arith.constant 0 : i32
    return %c0_i32, %c0_i32_0, %c0_i32_1 : i32, i32, i32
  }
  func.func @transform_1(%arg0: i32, %arg1: i32) -> (i32, i32, i32, i32) {
    %c0_i32 = arith.constant 0 : i32
    %c0_i32_0 = arith.constant 0 : i32
    %c0_i32_1 = arith.constant 0 : i32
    return %arg0, %c0_i32, %c0_i32_0, %arg1 : i32, i32, i32, i32
  }
  func.func @transform_2(%arg0: i32, %arg1: i32) -> (i32, i32, i32, i32) {
    %c0_i32 = arith.constant 0 : i32
    %c0_i32_0 = arith.constant 0 : i32
    %c0_i32_1 = arith.constant 0 : i32
    %c0_i32_2 = arith.constant 0 : i32
    return %arg0, %c0_i32, %c0_i32_0, %c0_i32_1 : i32, i32, i32, i32
  }
  func.func @transform_3(%arg0: i32, %arg1: i32) -> (i32, i32, i32, i32) {
    %c0_i32 = arith.constant 0 : i32
    %c0_i32_0 = arith.constant 0 : i32
    %c0_i32_1 = arith.constant 0 : i32
    %c0_i32_2 = arith.constant 0 : i32
    return %arg0, %c0_i32, %c0_i32_0, %c0_i32_1 : i32, i32, i32, i32
  }
  func.func @transform_4(%arg0: i32, %arg1: i32) -> (i32, i32) {
    %c0_i32 = arith.constant 0 : i32
    %c0_i32_0 = arith.constant 0 : i32
    %c0_i32_1 = arith.constant 0 : i32
    return %c0_i32, %c0_i32_0 : i32, i32
  }
  func.func @transform_5(%arg0: i32, %arg1: i32) -> (i32, i32, i32) {
    %c0_i32 = arith.constant 0 : i32
    %c0_i32_0 = arith.constant 0 : i32
    return %arg0, %c0_i32, %arg1 : i32, i32, i32
  }
  func.func @transform_6(%arg0: i32, %arg1: i32) -> (i32, i32, i32) {
    %c0_i32 = arith.constant 0 : i32
    %c0_i32_0 = arith.constant 0 : i32
    return %arg0, %c0_i32, %arg1 : i32, i32, i32
  }
}

</mosaic_0001>

<bundles_post_ra>
// kernel: reduced_attention_forward.1
= control target key start
LH: loop header
LB: loop body
LE: loop exit
PB: predicated region body
PF: predicated region fallthrough
CT: control target
= control target key end

     0   :  { %s1210_s21 = smov 0   ;;  %s1212_s22 = smov 0   ;;  %s1390_s0 = inlined_call_operand.vmem [shape: f32[2,1,1], index: 0, kind: input, shape index: {}]   ;;  %s1391_s1 = inlined_call_operand.vmem [shape: f32[2,2,16,256], index: 1, kind: input, shape index: {}]   ;;  %s1392_s2 = inlined_call_operand.vmem [shape: f32[2,2,16,16], index: 2, kind: input, shape index: {}]   ;;  %s1393_s3 = inlined_call_operand.vmem [shape: f32[2,2,16,16], index: 3, kind: input, shape index: {}]   ;;  %s1394_s4 = inlined_call_operand.vmem [shape: f32[32,32], index: 4, kind: input, shape index: {}]   ;;  %s1395_s5 = inlined_call_operand.vmem [shape: f32[2,32,256], index: 5, kind: input, shape index: {}]   ;;  %s1396_s6 = inlined_call_operand.vmem [shape: f32[2,32,256], index: 6, kind: output, shape index: {}]  }
   0x1   :  { %s1214_s23 = smov 0   ;;  %s1216_s24 = smov 0  }
   0x2   :  { %s1218_s25 = smov 0   ;;  %s1220_s26 = smov 0  }
   0x3   :  { %s1222_s27 = smov 0  }
   0x4 LB: > { %s25_s28 = sadd.s32 1, %s1164_s25  ;;  %s28_s29 = sadd.s32 1, %s1168_s26  ;;  %s1172_s27 = sphi %s1222_s27, %s16_s27   ;;  %s1168_s26 = sphi %s1220_s26, %s1404_s26   ;;  %s1164_s25 = sphi %s1218_s25, %s1403_s25   ;;  %s1160_s24 = sphi %s1216_s24, %s1402_s24   ;;  %s1156_s23 = sphi %s1214_s23, %s1401_s23   ;;  %s1152_s22 = sphi %s1212_s22, %s1400_s22   ;;  %s1148_s21 = sphi %s1210_s21, %s1399_s21  }
   0x5   : > { %p26_p0 = scmp.ge.s32.totalorder %s25_s28, 2  ;;  %s989_s30 = sadd.s32 4294967295, %s1172_s27  }
   0x6   : > { %p65_p1 = scmp.ne.s32.totalorder %s1152_s22, %s1148_s21  ;;  %p66_p2 = scmp.eq.s32.totalorder %s1172_s27, 0 }
   0x7   : > { %s1406_s28 = smov (%p26_p0, %s25_s28), 0  ;;  %s1408_s29 = smov (!%p26_p0, %s28_s29), %s1168_s26 }
   0x8   : > { %p30_p3 = scmp.ge.s32.totalorder %s1408_s29, 2  ;;  %p198_p4 = scmp.eq.s32.totalorder %s989_s30, 3 }
   0x9   : > { %s54_s7 = ssub.s32 %s1164_s25, %s1406_s28  ;;  %p1256_p5 = por %p66_p2, %p65_p1 }
   0xa   : > { %s1410_s29 = smov (%p30_p3, %s1408_s29), 0  ;;  %p1262_p6 = por %p198_p4, %p65_p1 }
   0xb   : > { %s53_s10 = ssub.s32 %s1168_s26, %s1410_s29  ;;  %s58_s12 = sadd.s32 1, %s1152_s22 }
   0xc   : > { %s55_s11 = sor.u32 %s54_s7, %s53_s10  ;;  %p992_p8 = scmp.ge.s32.totalorder %s1172_s27, 4 }
   0xd   : > { %p56_p7 = scmp.eq.s32.totalorder %s55_s11, 0 }
   0xe   : > { %226 = sbr.rel (%p992_p8) target bundleno = 39 (0x27), region = 24 }
   0xf   : > { %s1270_s13 = scalar_select %p56_p7, %s1152_s22, %s58_s12  }
  0x13   : > { %229 = sbr.rel (!%p1256_p5) target bundleno = 29 (0x1d), region = 28  ;;  %s231_s14 = sand.u32 (%p1256_p5), 1, %s1152_s22  }
  0x14   : > { %s994_s15 = sshll.u32 (%p1256_p5), %s1168_s26, 3  ;;  %s993_s16 = sshll.u32 (%p1256_p5), %s231_s14, 5 }
  0x15   : > { %s235_s17 = sadd.s32 (%p1256_p5), %s1164_s25, %s994_s15  ;;  %s233_s7 = scalar_lea.vmem (%p1256_p5), [#allocation2], %s993_s16 }
  0x16   : > { %s995_s18 = sshll.u32 (%p1256_p5), %s235_s17, 3 }
  0x17   : > { %s237_s30 = scalar_lea.vmem (%p1256_p5), %s1391_s1, %s995_s18 }
  0x18   : > { %v272_v0 = vld [vmem:[%s237_s30] sm:$0xff]  ;;  %v274_v1 = vld [vmem:[%s237_s30 + $0x10] sm:$0xff] }
  0x19   : > { %v276_v2 = vld [vmem:[%s237_s30 + $0x20] sm:$0xff]  ;;  %273 = vst [vmem:[%s233_s7] sm:$0xff] %v272_v0  ;;  %v278_v3 = vld [vmem:[%s237_s30 + $0x30] sm:$0xff] }
  0x1a   : > { %275 = vst [vmem:[%s233_s7 + $0x8] sm:$0xff] %v274_v1 }
  0x1b   : > { %277 = vst [vmem:[%s233_s7 + $0x10] sm:$0xff] %v276_v2 }
  0x1c   : > { %279 = vst [vmem:[%s233_s7 + $0x18] sm:$0xff] %v278_v3 }
  0x1d PF: > { %301 = sbr.rel (!%p1256_p5) target bundleno = 39 (0x27), region = 74  ;;  %s303_s10 = sand.u32 (%p1256_p5), 1, %s1152_s22  }
  0x1e   : > { %s997_s11 = sshll.u32 (%p1256_p5), %s1168_s26, 3  ;;  %s996_s12 = sshll.u32 (%p1256_p5), %s303_s10, 5 }
  0x1f   : > { %s307_s14 = sadd.s32 (%p1256_p5), %s1164_s25, %s997_s11  ;;  %s305_s19 = scalar_lea.vmem (%p1256_p5), [#allocation3], %s996_s12 }
  0x20   : > { %s998_s15 = sshll.u32 (%p1256_p5), %s307_s14, 3 }
  0x21   : > { %s309_s16 = scalar_lea.vmem (%p1256_p5), %s1395_s5, %s998_s15 }
  0x22   : > { %v344_v4 = vld [vmem:[%s309_s16] sm:$0xff]  ;;  %v346_v5 = vld [vmem:[%s309_s16 + $0x10] sm:$0xff] }
  0x23   : > { %v348_v6 = vld [vmem:[%s309_s16 + $0x20] sm:$0xff]  ;;  %345 = vst [vmem:[%s305_s19] sm:$0xff] %v344_v4  ;;  %v350_v7 = vld [vmem:[%s309_s16 + $0x30] sm:$0xff] }
  0x24   : > { %347 = vst [vmem:[%s305_s19 + $0x8] sm:$0xff] %v346_v5 }
  0x25   : > { %349 = vst [vmem:[%s305_s19 + $0x10] sm:$0xff] %v348_v6 }
  0x26   : > { %351 = vst [vmem:[%s305_s19 + $0x18] sm:$0xff] %v350_v7 }
  0x27 PF: > { %p999_p9 = scmp.ge.s32.totalorder %s1172_s27, 1  ;;  %p356_p10 = scmp.lt.s32.totalorder %s1172_s27, 5 }
  0x29   : > { %p357_p11 = pnand %p999_p9, %p356_p10 }
  0x2a   : > { %p412_p12 = scmp.lt.s32.totalorder (!%p357_p11), %s1160_s24, 1  ;;  %s363_s17 = sand.u32 (!%p357_p11), 1, %s1148_s21  }
  0x2b   : > { %360 = sbr.rel (%p357_p11) target bundleno = 807 (0x327), region = 112  ;;  %s1328_s18 = sshll.u32 (!%p357_p11), %s363_s17, 5 }
  0x2c   : > { %s365_s16 = scalar_lea.vmem (!%p357_p11), [#allocation2], %s1328_s18  ;;  %s372_s17 = scalar_lea.vmem (!%p357_p11), [#allocation3], %s1328_s18 }
  0x30   : > { %s1293_s8 = scalar_select %p412_p12, %s1160_s24, 1  ;;  %vm432_vm0 = vcmask 130048   ;;  %v1174_v20 = vmov 0   ;;  %v1092_v40 = vld [vmem:[%s1390_s0] ss:$0 sm:$0xff]  ;;  %v524_v0 = vld [vmem:[%s365_s16 + $0x8] sm:$0xff] }
  0x31   : > { %1090 = vset.pattern.permute.xlu0 %v1174_v20  ;;  %1089 = vset.pattern.permute.xlu2 %v1174_v20  ;;  %v1093_v56 = vld [vmem:[%s1390_s0 + $0x1] ss:$0 sm:$0xff]  ;;  %v528_v2 = vmul.f32 %v524_v0, %v524_v0  ;;  %v525_v6 = vld [vmem:[%s365_s16 + $0x10] sm:$0xff]  ;;  %v526_v7 = vld [vmem:[%s365_s16 + $0x18] sm:$0xff]  ;;  %s1020_s21 = sshll.u32 (%p1262_p6), %s1160_s24, 3 }
  0x32   : > { %s1024_s20 = sshll.u32 %s1293_s8, 5  ;;  %1091 = vset.pattern.permute.xlu1 %v1174_v20  ;;  %v523_v63 = vld [vmem:[%s365_s16] sm:$0xff]  ;;  %s411_s16 = scalar_lea.vmem [#allocation4], %s1328_s18 }
  0x33   : > { %s416_s10 = scalar_lea.vmem %s1392_s2, %s1024_s20  ;;  %v527_v1 = vmul.f32 %v523_v63, %v523_v63  ;;  %s421_s30 = scalar_lea.vmem %s1393_s3, %s1024_s20 }
  0x34   : > { %v1301_v8 = vld [vmem:[%s416_s10 + $0x8] sm:$0xff]  ;;  %v1303_v9 = vld [vmem:[%s416_s10] sm:$0xff]  ;;  %v1309_v12 = vld [vmem:[%s416_s10 + $0x18] sm:$0xff]  ;;  %s825_s18 = sadd.s32 (%p1262_p6), %s1156_s23, %s1020_s21 }
  0x35   : > { %v429_v10 = vmul.f32 %v1301_v8, %v1301_v8  ;;  %v428_v11 = vmul.f32 %v1303_v9, %v1303_v9  ;;  %v1311_v13 = vld [vmem:[%s416_s10 + $0x10] sm:$0xff]  ;;  %v431_v16 = vmul.f32 %v1309_v12, %v1309_v12  ;;  %v531_v3 = vadd.f32 %v528_v2, %v527_v1  ;;  %s1021_s19 = sshll.u32 (%p1262_p6), %s825_s18, 3 }
  0x36   : > { %v430_v17 = vmul.f32 %v1311_v13, %v1311_v13  ;;  %s827_s20 = scalar_lea.vmem (%p1262_p6), %s1396_s6, %s1021_s19 }
  0x37   : > { %v436_v14 = vsel %vm432_vm0, %v429_v10, 0.0  ;;  %v433_v15 = vsel %vm432_vm0, %v428_v11, 0.0  ;;  %v442_v18 = vsel %vm432_vm0, %v431_v16, 0.0  ;;  %v532_v4 = vrot.slane %v531_v3, 4 }
  0x38   : > { %437 = vadd.xlane.f32.xlu1 %v436_v14  ;;  %434 = vadd.xlane.f32.xlu0 %v433_v15  ;;  %v439_v19 = vsel %vm432_vm0, %v430_v17, 0.0  ;;  %v529_v11 = vmul.f32 %v525_v6, %v525_v6  ;;  %v530_v14 = vmul.f32 %v526_v7, %v526_v7 }
  0x39   : > { %v533_v5 = vadd.f32 %v532_v4, %v531_v3 }
  0x3a   : > { %v538_v16 = vadd.f32 %v530_v14, %v529_v11 }
  0x3b   : > { %v534_v10 = vrot.slane %v533_v5, 2 }
  0x3d   : > { %v535_v15 = vadd.f32 %v534_v10, %v533_v5 }
  0x3f   : > { %v536_v17 = vrot.slane %v535_v15, 1 }
  0x40   : > { %443 = vadd.xlane.f32.xlu1 %v442_v18  ;;  %440 = vadd.xlane.f32.xlu0 %v439_v19  ;;  %v539_v18 = vrot.slane %v538_v16, 4 }
  0x41   : > { %v537_v19 = vadd.f32 %v536_v17, %v535_v15 }
  0x42   : > { %v540_v20 = vadd.f32 %v539_v18, %v538_v16 }
  0xab   : > { %v438_v21 = vpop.xlane.xlu1 %437  ;;  %v435_v22 = vpop.xlane.xlu0 %434 }
  0xac   : > { %v446_v23 = vmax.f32 %v438_v21, 1e-24  ;;  %v445_v24 = vmax.f32 %v435_v22, 1e-24  ;;  %v545_v21 = vmax.f32 %v537_v19, 1e-24 }
  0xad   : > { %v541_v22 = vrot.slane %v540_v20, 2 }
  0xae   : > { %1094 = vrsqrt.f32 %v446_v23  ;;  %vm455_vm1 = vweird.f32 %v445_v24  ;;  %vm465_vm4 = vweird.f32 %v446_v23  ;;  %vm553_vm13 = vweird.f32 %v545_v21 }
  0xaf   : > { %1096 = vrsqrt.f32 %v445_v24 }
  0xb3   : > { %v444_v25 = vpop.xlane.xlu1 %443  ;;  %v441_v26 = vpop.xlane.xlu0 %440 }
  0xb4   : > { %v1095_v27 = vpop.eup %1094  ;;  %v448_v28 = vmax.f32 %v444_v25, 1e-24  ;;  %v447_v29 = vmax.f32 %v441_v26, 1e-24 }
  0xb5   : > { %v1097_v30 = vpop.eup %1096  ;;  %v460_v31 = vmul.f32 %v1095_v27, %v446_v23  ;;  %vm466_vm3 = vweird.f32 %v1095_v27  ;;  %v542_v23 = vadd.f32 %v541_v22, %v540_v20 }
  0xb6   : > { %v450_v32 = vmul.f32 %v1097_v30, %v445_v24  ;;  %1098 = vrsqrt.f32 %v448_v28  ;;  %vm456_vm2 = vweird.f32 %v1097_v30  ;;  %vm467_vm6 = vmor %vm465_vm4, %vm466_vm3  ;;  %vm475_vm7 = vweird.f32 %v447_v29 }
  0xb7   : > { %v461_v33 = vmul.f32 %v1095_v27, %v460_v31  ;;  %1100 = vrsqrt.f32 %v447_v29  ;;  %vm457_vm5 = vmor %vm455_vm1, %vm456_vm2  ;;  %vm485_vm10 = vweird.f32 %v448_v28  ;;  %v543_v24 = vrot.slane %v542_v23, 1 }
  0xb8   : > { %v451_v34 = vmul.f32 %v1097_v30, %v450_v32  ;;  %1102 = vrsqrt.f32 %v545_v21 }
  0xb9   : > { %v462_v35 = vmul.f32 0.5, %v461_v33  ;;  %v544_v25 = vadd.f32 %v543_v24, %v542_v23 }
  0xba   : > { %v452_v36 = vmul.f32 0.5, %v451_v34 }
  0xbb   : > { %v463_v37 = vsub.f32 1.5, %v462_v35 }
  0xbc   : > { %v1099_v38 = vpop.eup %1098  ;;  %v453_v39 = vsub.f32 1.5, %v452_v36 }
  0xbd   : > { %v1101_v41 = vpop.eup %1100  ;;  %v480_v42 = vmul.f32 %v1099_v38, %v448_v28  ;;  %v464_v43 = vmul.f32 %v1095_v27, %v463_v37  ;;  %vm486_vm9 = vweird.f32 %v1099_v38 }
  0xbe   : > { %v470_v44 = vmul.f32 %v1101_v41, %v447_v29  ;;  %v454_v45 = vmul.f32 %v1097_v30, %v453_v39  ;;  %vm476_vm8 = vweird.f32 %v1101_v41  ;;  %vm487_vm12 = vmor %vm485_vm10, %vm486_vm9  ;;  %v1103_v26 = vpop.eup %1102 }
  0xbf   : > { %v481_v46 = vmul.f32 %v1099_v38, %v480_v42  ;;  %v468_v47 = vsel %vm467_vm6, %v1095_v27, %v464_v43  ;;  %vm477_vm11 = vmor %vm475_vm7, %vm476_vm8  ;;  %v546_v27 = vmax.f32 %v544_v25, 1e-24  ;;  %v548_v28 = vmul.f32 %v1103_v26, %v545_v21 }
  0xc0   : > { %v471_v48 = vmul.f32 %v1101_v41, %v470_v44  ;;  %v496_v49 = vmul.f32 %v1092_v40, %v468_v47  ;;  %v458_v50 = vsel %vm457_vm5, %v1097_v30, %v454_v45  ;;  %vm554_vm14 = vweird.f32 %v1103_v26 }
  0xc1   : > { %v482_v51 = vmul.f32 0.5, %v481_v46  ;;  %v495_v52 = vmul.f32 %v1092_v40, %v458_v50  ;;  %1104 = vrsqrt.f32 %v546_v27  ;;  %v549_v29 = vmul.f32 %v1103_v26, %v548_v28  ;;  %vm555_vm15 = vmor %vm553_vm13, %vm554_vm14 }
  0xc2   : > { %v472_v53 = vmul.f32 0.5, %v471_v48  ;;  %506 = vperm.xlu0 %1090, %v496_v49   ;;  %vm563_vm1 = vweird.f32 %v546_v27 }
  0xc3   : > { %v483_v54 = vsub.f32 1.5, %v482_v51  ;;  %501 = vperm.xlu2 %1089, %v495_v52   ;;  %v550_v30 = vmul.f32 0.5, %v549_v29 }
  0xc4   : > { %v473_v55 = vsub.f32 1.5, %v472_v53 }
  0xc5   : > { %v484_v57 = vmul.f32 %v1099_v38, %v483_v54  ;;  %v551_v31 = vsub.f32 1.5, %v550_v30 }
  0xc6   : > { %v474_v58 = vmul.f32 %v1101_v41, %v473_v55 }
  0xc7   : > { %v488_v59 = vsel %vm487_vm12, %v1099_v38, %v484_v57  ;;  %v1105_v32 = vpop.eup %1104  ;;  %v552_v33 = vmul.f32 %v1103_v26, %v551_v31  ;;  %vm771_vm12 = vcmask 261120  }
  0xc8   : > { %v498_v60 = vmul.f32 %v1093_v56, %v488_v59  ;;  %v478_v61 = vsel %vm477_vm11, %v1101_v41, %v474_v58  ;;  %v558_v34 = vmul.f32 %v1105_v32, %v546_v27  ;;  %vm564_vm2 = vweird.f32 %v1105_v32 }
  0xc9   : > { %v497_v62 = vmul.f32 %v1093_v56, %v478_v61  ;;  %v556_v35 = vsel %vm555_vm15, %v1103_v26, %v552_v33  ;;  %vm565_vm3 = vmor %vm563_vm1, %vm564_vm2 }
  0xca   : > { %516 = vperm.xlu1 %1091, %v498_v60   ;;  %v559_v36 = vmul.f32 %v1105_v32, %v558_v34  ;;  %v568_v37 = vmul.f32 %v556_v35, %v524_v0  ;;  %v567_v39 = vmul.f32 %v556_v35, %v523_v63 }
  0xcb   : > { %511 = vperm.xlu2 %1089, %v497_v62  }
  0xcc   : > { %v560_v38 = vmul.f32 0.5, %v559_v36  ;;  %591 = vmatpush.msra.mxu1 %v568_v37  ;;  %1026 = vmatpush.msra.mxu3 %v568_v37 }
  0xce   : > { %v561_v40 = vsub.f32 1.5, %v560_v38  ;;  %592 = vmatpush.msra.mxu1 %v567_v39  ;;  %1027 = vmatpush.msra.mxu3 %v567_v39 }
  0xd0   : > { %v562_v41 = vmul.f32 %v1105_v32, %v561_v40 }
  0xd2   : > { %v566_v42 = vsel %vm565_vm3, %v1105_v32, %v562_v41 }
  0xd3   : > { %v570_v43 = vmul.f32 %v566_v42, %v526_v7  ;;  %v569_v44 = vmul.f32 %v566_v42, %v525_v6 }
  0xd5   : > { %620 = vmatpush.msrb.mxu1 %v570_v43 }
  0xd7   : > { %621 = vmatpush.msrb.mxu1 %v569_v44 }
 0x11d   : > { %v502_v45 = vpop.permute.xlu2 %501 }
 0x11e   : > { %v519_v46 = vmul.f32 %v502_v45, %v1303_v9 }
 0x120   : > { %1007 = vmatmul.msk.f32.vlgmr.msra.gmra.mxu1 %vm432_vm0, %v519_v46 }
 0x125   : > { %v512_v47 = vpop.permute.xlu2 %511 }
 0x126   : > { %v521_v48 = vmul.f32 %v512_v47, %v1311_v13 }
 0x128   : > { %1009 = vmatmul.msk.f32.vlgmr.msrb.gmra.mxu1 %vm432_vm0, %v521_v48 }
 0x134   : > { %v507_v49 = vpop.permute.xlu0 %506 }
 0x135   : > { %v520_v50 = vmul.f32 %v507_v49, %v1301_v8 }
 0x137   : > { %1008 = vmatmul.msk.f32.vlgmr.msra.gmra.mxu3 %vm432_vm0, %v520_v50 }
 0x13c   : > { %v517_v51 = vpop.permute.xlu1 %516 }
 0x13d   : > { %v522_v52 = vmul.f32 %v517_v51, %v1309_v12 }
 0x13f   : > { %1010 = vmatmul.msk.f32.gmra.mxu1 %vm432_vm0, %v522_v52 }
 0x19d   : > { %v594_v53 = vpop.f32.mrf.mxu1 }
 0x1a5   : > { %v623_v54 = vpop.f32.mrf.mxu1 }
 0x1ba   : > { %v597_v9 = vpop.f32.mrf.mxu3 }
 0x1bb   : > { %v629_v55 = vmax.f32 %v594_v53, %v597_v9 }
 0x1bc   : > { %v626_v56 = vpop.f32.mrf.mxu1 }
 0x1bd   : > { %v630_v57 = vrot.slane %v629_v55, 4  ;;  %v636_v58 = vmax.f32 %v623_v54, %v626_v56 }
 0x1bf   : > { %v631_v13 = vmax.f32 %v629_v55, %v630_v57  ;;  %v637_v59 = vrot.slane %v636_v58, 4  ;;  %v701_v55 = vld [vmem:[%s421_s30] sm:$0xff]  ;;  %v703_v57 = vld [vmem:[%s421_s30 + $0x10] sm:$0xff] }
 0x1c1   : > { %v632_v60 = vrot.slane %v631_v13, 2  ;;  %v638_v61 = vmax.f32 %v636_v58, %v637_v59  ;;  %v702_v58 = vld [vmem:[%s421_s30 + $0x8] sm:$0xff] }
 0x1c3   : > { %v633_v62 = vmax.f32 %v631_v13, %v632_v60  ;;  %v639_v8 = vrot.slane %v638_v61, 2  ;;  %v704_v13 = vld [vmem:[%s421_s30 + $0x18] sm:$0xff] }
 0x1c5   : > { %v634_v63 = vrot.slane %v633_v62, 1  ;;  %v640_v0 = vmax.f32 %v638_v61, %v639_v8  ;;  %v763_v8 = vld [vmem:[%s1394_s4] sm:$0xff] }
 0x1c7   : > { %v635_v1 = vmax.f32 %v633_v62, %v634_v63  ;;  %v641_v2 = vrot.slane %v640_v0, 1  ;;  %v766_v63 = vld [vmem:[%s1394_s4 + $0x18] sm:$0xff] }
 0x1c9   : > { %v643_v12 = vsub.f32 %v594_v53, %v635_v1  ;;  %v644_v3 = vsub.f32 %v597_v9, %v635_v1  ;;  %v642_v4 = vmax.f32 %v640_v0, %v641_v2  ;;  %v764_v0 = vld [vmem:[%s1394_s4 + $0x8] sm:$0xff]  ;;  %v765_v1 = vld [vmem:[%s1394_s4 + $0x10] sm:$0xff]  ;;  %v767_v2 = vld [vmem:[%s372_s17] sm:$0xff] }
 0x1cb   : > { %v647_v5 = vmul.f32 1.442695, %v643_v12  ;;  %v649_v6 = vmul.f32 1.442695, %v644_v3  ;;  %v645_v7 = vsub.f32 %v623_v54, %v642_v4  ;;  %v646_v10 = vsub.f32 %v626_v56, %v642_v4  ;;  %v770_v4 = vld [vmem:[%s372_s17 + $0x18] sm:$0xff] }
 0x1cd   : > { %1106 = vpow2.f32 %v647_v5  ;;  %v651_v11 = vmul.f32 1.442695, %v645_v7  ;;  %v653_v14 = vmul.f32 1.442695, %v646_v10  ;;  %v768_v5 = vld [vmem:[%s372_s17 + $0x8] sm:$0xff] }
 0x1ce   : > { %1108 = vpow2.f32 %v649_v6 }
 0x1cf   : > { %1110 = vpow2.f32 %v651_v11 }
 0x1d0   : > { %1112 = vpow2.f32 %v653_v14  ;;  %v769_v14 = vld [vmem:[%s372_s17 + $0x10] sm:$0xff] }
 0x1d3   : > { %v1107_v15 = vpop.eup %1106 }
 0x1d4   : > { %v1109_v16 = vpop.eup %1108 }
 0x1d5   : > { %v1111_v17 = vpop.eup %1110  ;;  %v655_v18 = vadd.f32 %v1109_v16, %v1107_v15 }
 0x1d6   : > { %v1113_v19 = vpop.eup %1112 }
 0x1d7   : > { %v656_v20 = vrot.slane %v655_v18, 4  ;;  %v662_v21 = vadd.f32 %v1113_v19, %v1111_v17 }
 0x1d9   : > { %v657_v22 = vadd.f32 %v656_v20, %v655_v18  ;;  %v663_v23 = vrot.slane %v662_v21, 4 }
 0x1db   : > { %v658_v24 = vrot.slane %v657_v22, 2  ;;  %v664_v25 = vadd.f32 %v663_v23, %v662_v21 }
 0x1dd   : > { %v659_v26 = vadd.f32 %v658_v24, %v657_v22  ;;  %v665_v27 = vrot.slane %v664_v25, 2 }
 0x1df   : > { %v660_v28 = vrot.slane %v659_v26, 1  ;;  %v666_v29 = vadd.f32 %v665_v27, %v664_v25 }
 0x1e1   : > { %v661_v30 = vadd.f32 %v660_v28, %v659_v26  ;;  %v667_v31 = vrot.slane %v666_v29, 1 }
 0x1e3   : > { %1114 = vrcp.f32 %v661_v30  ;;  %v668_v32 = vadd.f32 %v667_v31, %v666_v29  ;;  %v680_v38 = vand.u32 2147483648, %v661_v30  ;;  %v678_v40 = vand.u32 2147483647, %v661_v30 }
 0x1e4   : > { %vm674_vm5 = vweird.f32 %v661_v30 }
 0x1e5   : > { %1116 = vrcp.f32 %v668_v32  ;;  %v694_v42 = vand.u32 2147483648, %v668_v32  ;;  %v692_v45 = vand.u32 2147483647, %v668_v32  ;;  %v681_v46 = vor.u32 1.1754944e-38, %v680_v38 }
 0x1e6   : > { %vm679_vm8 = vcmp.eq.f32.partialorder %v678_v40, 8.507059e+37  ;;  %vm688_vm9 = vweird.f32 %v668_v32 }
 0x1e7   : > { %v695_v50 = vor.u32 1.1754944e-38, %v694_v42  ;;  %vm693_vm11 = vcmp.eq.f32.partialorder %v692_v45, 8.507059e+37 }
 0x1e9   : > { %v1115_v33 = vpop.eup %1114 }
 0x1ea   : > { %v670_v34 = vmul.f32 %v1115_v33, %v661_v30  ;;  %vm675_vm4 = vweird.f32 %v1115_v33 }
 0x1eb   : > { %v1117_v35 = vpop.eup %1116  ;;  %vm676_vm7 = vmor %vm674_vm5, %vm675_vm4 }
 0x1ec   : > { %v671_v36 = vsub.f32 1.0, %v670_v34  ;;  %v684_v37 = vmul.f32 %v1117_v35, %v668_v32  ;;  %vm689_vm6 = vweird.f32 %v1117_v35 }
 0x1ed   : > { %vm690_vm10 = vmor %vm688_vm9, %vm689_vm6 }
 0x1ee   : > { %v672_v39 = vmul.f32 %v1115_v33, %v671_v36  ;;  %v685_v41 = vsub.f32 1.0, %v684_v37 }
 0x1f0   : > { %v673_v43 = vadd.f32 %v1115_v33, %v672_v39  ;;  %v686_v44 = vmul.f32 %v1117_v35, %v685_v41 }
 0x1f2   : > { %v677_v47 = vsel %vm676_vm7, %v1115_v33, %v673_v43  ;;  %v687_v48 = vadd.f32 %v1117_v35, %v686_v44 }
 0x1f3   : > { %v682_v49 = vsel %vm679_vm8, %v681_v46, %v677_v47 }
 0x1f4   : > { %v698_v51 = vmul.f32 %v1109_v16, %v682_v49  ;;  %v691_v52 = vsel %vm690_vm10, %v1117_v35, %v687_v48  ;;  %v697_v54 = vmul.f32 %v1107_v15, %v682_v49 }
 0x1f5   : > { %v696_v53 = vsel %vm693_vm11, %v695_v50, %v691_v52 }
 0x1f6   : > { %725 = vmatpush.msra.mxu2 %v698_v51  ;;  %v700_v9 = vmul.f32 %v1113_v19, %v696_v53  ;;  %v699_v56 = vmul.f32 %v1111_v17, %v696_v53 }
 0x1f8   : > { %726 = vmatpush.msra.mxu2 %v697_v54  ;;  %754 = vmatpush.msrb.mxu3 %v700_v9 }
 0x1f9   : > { %1011 = vmatmul.msk.f32.vlgmr.msra.gmra.mxu2 %vm432_vm0, %v701_v55 }
 0x1fa   : > { %755 = vmatpush.msrb.mxu3 %v699_v56 }
 0x1fb   : > { %1013 = vmatmul.msk.f32.vlgmr.msrb.gmra.mxu3 %vm432_vm0, %v703_v57 }
 0x201   : > { %1012 = vmatmul.msk.f32.gmra.mxu2 %vm432_vm0, %v702_v58 }
 0x203   : > { %1014 = vmatmul.msk.f32.gmra.mxu3 %vm432_vm0, %v704_v13 }
 0x27c   : > { %v728_v60 = vpop.f32.mrf.mxu2 }
 0x27e   : > { %v757_v59 = vpop.f32.mrf.mxu3 }
 0x284   : > { %v731_v62 = vpop.f32.mrf.mxu2 }
 0x286   : > { %v760_v61 = vpop.f32.mrf.mxu3 }
 0x287   : > { %796 = vmatpush.msra.mxu0 %v760_v61  ;;  %1028 = vmatpush.msrb.mxu2 %v760_v61 }
 0x289   : > { %797 = vmatpush.msra.mxu0 %v757_v59  ;;  %1029 = vmatpush.msrb.mxu2 %v757_v59 }
 0x28b   : > { %798 = vmatpush.msra.mxu0 %v731_v62  ;;  %1030 = vmatpush.msrb.mxu2 %v731_v62 }
 0x28d   : > { %799 = vmatpush.msra.mxu0 %v728_v60  ;;  %1031 = vmatpush.msrb.mxu2 %v728_v60 }
 0x28e   : > { %1015 = vmatmul.msk.f32.vlgmr.msra.gmra.mxu0 %vm771_vm12, %v763_v8  ;;  %1018 = vmatmul.msk.f32.vlgmr.msrb.gmra.mxu2 %vm771_vm12, %v766_v63 }
 0x296   : > { %1016 = vmatmul.msk.f32.gmra.mxu0 %vm771_vm12, %v764_v0 }
 0x29e   : > { %1017 = vmatmul.msk.f32.gmra.mxu0 %vm771_vm12, %v765_v1 }
 0x30b   : > { %v801_v12 = vpop.f32.mrf.mxu0 }
 0x30c   : > { %v802_v3 = vadd.f32 %v801_v12, %v767_v2 }
 0x30e   : > { %813 = vst [vmem:[%s411_s16] sm:$0xff] %v802_v3 }
 0x311   : > { %v810_v6 = vpop.f32.mrf.mxu2 }
 0x312   : > { %v811_v7 = vadd.f32 %v810_v6, %v770_v4 }
 0x313   : > { %v804_v10 = vpop.f32.mrf.mxu0 }
 0x314   : > { %v805_v11 = vadd.f32 %v804_v10, %v768_v5  ;;  %816 = vst [vmem:[%s411_s16 + $0x18] sm:$0xff] %v811_v7 }
 0x315   : > { %v862_v17 = vld [vmem:[%s411_s16] sm:$0xff] (%p1262_p6) }
 0x316   : > { %814 = vst [vmem:[%s411_s16 + $0x8] sm:$0xff] %v805_v11 }
 0x317   : > { %863 = vst [vmem:[%s827_s20] sm:$0xff] (%p1262_p6), %v862_v17 }
 0x31a   : > { %823 = sbr.rel (!%p1262_p6) target bundleno = 807 (0x327), region = 124 }
 0x31b   : > { %v807_v15 = vpop.f32.mrf.mxu0  ;;  %v868_v20 = vld [vmem:[%s411_s16 + $0x18] sm:$0xff] (%p1262_p6) }
 0x31c   : > { %v808_v16 = vadd.f32 %v807_v15, %v769_v14  ;;  %869 = vst [vmem:[%s827_s20 + $0x30] sm:$0xff] (%p1262_p6), %v868_v20 }
 0x31d   : > { %v864_v18 = vld [vmem:[%s411_s16 + $0x8] sm:$0xff] (%p1262_p6) }
 0x31e   : > { %815 = vst [vmem:[%s411_s16 + $0x10] sm:$0xff] %v808_v16 }
 0x31f   : > { %865 = vst [vmem:[%s827_s20 + $0x10] sm:$0xff] %v864_v18 }
 0x325   : > { %v866_v19 = vld [vmem:[%s411_s16 + $0x10] sm:$0xff] }
 0x326   : > { %867 = vst [vmem:[%s827_s20 + $0x20] sm:$0xff] %v866_v19 }
 0x327 PF: > { %s16_s27 = sadd.s32 1, %s1172_s27   ;;  %s1399_s21 = smov %s1152_s22 }
 0x328   : > { %p13_p13 = scmp.ge.s32.totalorder %s16_s27, 6   ;;  %s1400_s22 = smov %s1270_s13 }
 0x329   : > { %s1401_s23 = smov %s1164_s25  ;;  %s1402_s24 = smov %s1168_s26 }
 0x32a   : > { %s1403_s25 = smov %s1406_s28  ;;  %s1404_s26 = smov %s1410_s29 }
 0x32b   :  { %15 = sbr.rel (!%p13_p13) target bundleno = 4 (0x4), region = 207 }

</bundles_post_ra>
